<compile_context>
chip_gen: v7x
topology: tpu7x:2x2x1
jax: 0.10.0
libtpu: 0.0.40
codegen_flags: <defaults>
</compile_context>

<pallas_src>
import functools

import jax
import jax.numpy as jnp
from jax import lax
from jax.experimental import pallas as pl
from jax.experimental.pallas import tpu as pltpu


def _round_up(x, m):
    return (x + m - 1) // m * m


def _ffn_kernel(x_ref, w1_ref, b1_ref, w2_ref, b2_ref, o_ref, *, approximate):
    # x_ref:  (TM, Dp)   f32 token tile (same block across the hidden axis)
    # w1_ref: (Dp, TH)   bf16 hidden chunk of W1     b1_ref: (1, TH) f32
    # w2_ref: (TH, Dp)   bf16 hidden chunk of W2     b2_ref: (1, Dp) f32
    # o_ref:  (TM, Dp)   f32, resident across the hidden axis -> accumulator
    k = pl.program_id(1)

    @pl.when(k == 0)
    def _():
        # Initialize the resident output block with the second bias.
        o_ref[...] = jnp.broadcast_to(b2_ref[...], o_ref.shape).astype(o_ref.dtype)

    x = x_ref[...].astype(jnp.bfloat16)
    h = jnp.dot(x, w1_ref[...], preferred_element_type=jnp.float32) + b1_ref[...]

    if approximate:
        # tanh-approx GELU: tanh lowers to the EUP slot (otherwise idle), freeing the
        # VALU slot on v6e/v7x where the MXU is fast enough to co-bottleneck on VPU.
        h = 0.5 * h * (1.0 + jnp.tanh(0.7978845608028654 * (h + 0.044715 * h * h * h)))
    else:
        # Exact (erf-based) GELU, matching torch.nn.GELU() default numerics.
        h = 0.5 * h * (1.0 + lax.erf(h * 0.7071067811865475))

    # dropout: identity (eval mode)
    o_ref[...] += jnp.dot(h.astype(jnp.bfloat16), w2_ref[...],
                          preferred_element_type=jnp.float32).astype(o_ref.dtype)


def prepare_ffn_params(w1, b1, w2, b2, *, hidden_tile=2048):
    """One-time parameter prep (hoisted out of the per-call path).

    Pads feature dims to lane-dense multiples of 128, chooses the hidden-chunk size,
    and casts weights to bf16.  Returns padded params + the static hidden tile size.
    w1: (model_dim, hidden_dim), w2: (hidden_dim, model_dim) -- (in, out) layout.
    """
    D, H = w1.shape
    hidden_tile = max(128, _round_up(hidden_tile, 128))

    Dp = _round_up(D, 128)
    Hp0 = _round_up(H, 128)
    n_h = -(-Hp0 // hidden_tile)                    # number of hidden chunks
    tk_h = _round_up(-(-Hp0 // n_h), 128)           # chunk size, multiple of 128
    Hp = _round_up(Hp0, tk_h)                       # padded hidden dim

    w1p = jnp.pad(w1, ((0, Dp - D), (0, Hp - H))).astype(jnp.bfloat16)
    w2p = jnp.pad(w2, ((0, Hp - H), (0, Dp - D))).astype(jnp.bfloat16)
    b1p = jnp.pad(b1, (0, Hp - H)).reshape(1, Hp).astype(jnp.float32)
    b2p = jnp.pad(b2, (0, Dp - D)).reshape(1, Dp).astype(jnp.float32)
    return w1p, b1p, w2p, b2p, tk_h


def _vmem_limit_bytes():
    """Per-generation VMEM scoped limit: ~75% of physical, capped at 100 MiB."""
    try:
        cap = pltpu.get_tpu_info().vmem_capacity_bytes
    except Exception:
        cap = 64 << 20  # conservative fallback (v7x per-TC size)
    return min(int(cap * 3 // 4), 100 << 20)


@functools.partial(jax.jit,
                   static_argnames=("tk_h", "token_tile", "approximate_gelu"))
def feed_forward(x, w1p, b1p, w2p, b2p, *, tk_h, token_tile=512,
                 approximate_gelu=False):
    """x: (batch, seq, model_dim) f32 -> (batch, seq, model_dim) f32.

    w1p/b1p/w2p/b2p are the padded bf16/f32 params from prepare_ffn_params.
    """
    B, S, D = x.shape
    Dp, Hp = w1p.shape
    assert Hp % tk_h == 0
    T = B * S

    # Large MXU-friendly token tile; small inputs just get one (multiple-of-16) tile.
    tm = min(token_tile, _round_up(T, 16))
    Tp = _round_up(T, tm)

    x2d = jnp.pad(x.reshape(T, D), ((0, Tp - T), (0, Dp - D)))

    n_i = Tp // tm
    n_k = Hp // tk_h
    grid = (n_i, n_k)

    cost = pl.CostEstimate(
        flops=4 * Tp * Dp * Hp,                            # two matmuls
        transcendentals=(Tp * Hp) if approximate_gelu else 0,  # erf is a VPU polynomial
        bytes_accessed=(2 * Tp * Dp * 4                    # x in + out
                        + n_i * 2 * Dp * Hp * 2            # W1 + W2 (bf16, per token tile)
                        + n_i * (Hp + Dp) * 4),            # biases
    )

    kernel = functools.partial(_ffn_kernel, approximate=approximate_gelu)

    out2d = pl.pallas_call(
        kernel,
        out_shape=jax.ShapeDtypeStruct((Tp, Dp), x.dtype),
        grid_spec=pltpu.PrefetchScalarGridSpec(
            num_scalar_prefetch=0,
            grid=grid,
            in_specs=[
                pl.BlockSpec((tm, Dp), lambda i, k: (i, 0)),    # token tile
                pl.BlockSpec((Dp, tk_h), lambda i, k: (0, k)),  # W1 hidden chunk (bf16)
                pl.BlockSpec((1, tk_h), lambda i, k: (0, k)),   # b1 hidden chunk
                pl.BlockSpec((tk_h, Dp), lambda i, k: (k, 0)),  # W2 hidden chunk (bf16)
                # b2 is constant across the whole grid (tiny: Dp*4 bytes).
                pl.BlockSpec((1, Dp), lambda i, k: (0, 0)),
            ],
            out_specs=pl.BlockSpec((tm, Dp), lambda i, k: (i, 0)),
        ),
        compiler_params=pltpu.CompilerParams(
            dimension_semantics=("parallel", "arbitrary"),
            vmem_limit_bytes=_vmem_limit_bytes(),
        ),
        cost_estimate=cost,
    )(x2d, w1p, b1p, w2p, b2p)

    return out2d[:T, :D].reshape(B, S, D)


def _reference(x, w1, b1, w2, b2):
    h = jnp.einsum("bsd,dh->bsh", x, w1) + b1
    h = 0.5 * h * (1.0 + lax.erf(h * 0.7071067811865475))
    return jnp.einsum("bsh,hd->bsd", h, w2) + b2


def _run_case(key, batch, seq, model_dim, hidden_dim, hidden_tile):
    kx, k1, kb1, k2, kb2 = jax.random.split(key, 5)
    x = jax.random.normal(kx, (batch, seq, model_dim), dtype=jnp.float32)
    # nn.Linear parameters, stored transposed as (in, out) for row-major x @ W.
    w1 = jax.random.normal(k1, (model_dim, hidden_dim), dtype=jnp.float32) * 0.05
    b1 = jax.random.normal(kb1, (hidden_dim,), dtype=jnp.float32) * 0.05
    w2 = jax.random.normal(k2, (hidden_dim, model_dim), dtype=jnp.float32) * 0.05
    b2 = jax.random.normal(kb2, (model_dim,), dtype=jnp.float32) * 0.05

    w1p, b1p, w2p, b2p, tk_h = prepare_ffn_params(w1, b1, w2, b2,
                                                  hidden_tile=hidden_tile)
    out = feed_forward(x, w1p, b1p, w2p, b2p, tk_h=tk_h)
    jax.block_until_ready(out)

    ref = _reference(x, w1, b1, w2, b2)
    assert out.shape == (batch, seq, model_dim)
    # bf16 matmul inputs (f32 accumulation) -> relaxed tolerance vs the f32 reference.
    assert jnp.allclose(out, ref, atol=2e-2, rtol=2e-2)


if __name__ == "__main__":
    key = jax.random.PRNGKey(0)
    k_small, k_dense, k_chunk = jax.random.split(key, 3)

    # Small shapes consistent with the module (exercises 128-lane padding path).
    _run_case(k_small, batch=2, seq=8, model_dim=32, hidden_dim=64, hidden_tile=2048)
    # Lane-dense shapes (no padding), single hidden chunk.
    _run_case(k_dense, batch=2, seq=128, model_dim=128, hidden_dim=256, hidden_tile=2048)
    # Multi-chunk hidden dim (exercises the "arbitrary" accumulator grid axis).
    _run_case(k_chunk, batch=2, seq=64, model_dim=128, hidden_dim=512, hidden_tile=256)

    print("KERNEL_OK")
</pallas_src>

<mosaic_0001>
module attributes {stable_mosaic.version = 11 : i64} {
  func.func @_ffn_kernel(%arg0: i32, %arg1: i32, %arg2: memref<16x128xf32, #tpu.memory_space<vmem>>, %arg3: memref<128x128xbf16, #tpu.memory_space<vmem>>, %arg4: memref<1x128xf32, #tpu.memory_space<vmem>>, %arg5: memref<128x128xbf16, #tpu.memory_space<vmem>>, %arg6: memref<1x128xf32, #tpu.memory_space<vmem>>, %arg7: memref<16x128xf32, #tpu.memory_space<vmem>>) attributes {dimension_semantics = [#tpu.dimension_semantics<parallel>, #tpu.dimension_semantics<arbitrary>], iteration_bounds = array<i64: 1, 1>, scalar_prefetch = 0 : i64, scratch_operands = 0 : i64, tpu.core_type = #tpu.core_type<tc>, window_params = [{transform_indices = @transform_0, window_bounds = array<i64: 16, 128>}, {transform_indices = @transform_1, window_bounds = array<i64: 128, 128>}, {transform_indices = @transform_2, window_bounds = array<i64: 1, 128>}, {transform_indices = @transform_3, window_bounds = array<i64: 128, 128>}, {pipeline_mode = #tpu.pipeline_mode<synchronous>, transform_indices = @transform_4, window_bounds = array<i64: 1, 128>}, {transform_indices = @transform_5, window_bounds = array<i64: 16, 128>}]} {
    %c0_i32 = arith.constant 0 : i32
    %0 = arith.cmpi eq, %arg1, %c0_i32 : i32
    %1 = arith.extui %0 : i1 to i32
    %c0_i32_0 = arith.constant 0 : i32
    %2 = arith.cmpi ne, %1, %c0_i32_0 : i32
    scf.if %2 {
      %c0_16 = arith.constant 0 : index
      %c0_17 = arith.constant 0 : index
      %24 = vector.load %arg6[%c0_16, %c0_17] : memref<1x128xf32, #tpu.memory_space<vmem>>, vector<1x128xf32>
      %25 = vector.shape_cast %24 : vector<1x128xf32> to vector<1x128xf32>
      %26 = vector.broadcast %25 : vector<1x128xf32> to vector<16x128xf32>
      %c0_18 = arith.constant 0 : index
      %c0_19 = arith.constant 0 : index
      %27 = vector.load %arg7[%c0_18, %c0_19] : memref<16x128xf32, #tpu.memory_space<vmem>>, vector<16x128xf32>
      tpu.vector_store %arg7[%c0_18, %c0_19], %26 {strides = array<i32>} : memref<16x128xf32, #tpu.memory_space<vmem>>, vector<16x128xf32>,
    } else {
    }
    %c0 = arith.constant 0 : index
    %c0_1 = arith.constant 0 : index
    %3 = vector.load %arg2[%c0, %c0_1] : memref<16x128xf32, #tpu.memory_space<vmem>>, vector<16x128xf32>
    %4 = arith.truncf %3 : vector<16x128xf32> to vector<16x128xbf16>
    %c0_2 = arith.constant 0 : index
    %c0_3 = arith.constant 0 : index
    %5 = vector.load %arg3[%c0_2, %c0_3] : memref<128x128xbf16, #tpu.memory_space<vmem>>, vector<128x128xbf16>
    %cst = arith.constant dense<0.000000e+00> : vector<16x128xf32>
    %6 = tpu.matmul %4, %5, %cst {dimension_numbers = #tpu.dot_dimension_numbers<[1], [0], [0], [1], [0, 0, 1, 1], [], []>} : vector<16x128xbf16>, vector<128x128xbf16>, vector<16x128xf32> -> vector<16x128xf32>
    %c0_4 = arith.constant 0 : index
    %c0_5 = arith.constant 0 : index
    %7 = vector.load %arg4[%c0_4, %c0_5] : memref<1x128xf32, #tpu.memory_space<vmem>>, vector<1x128xf32>
    %8 = vector.broadcast %7 : vector<1x128xf32> to vector<16x128xf32>
    %9 = arith.addf %6, %8 : vector<16x128xf32>
    %cst_6 = arith.constant 5.000000e-01 : f32
    %10 = vector.broadcast %cst_6 : f32 to vector<16x128xf32>
    %11 = arith.mulf %10, %9 : vector<16x128xf32>
    %cst_7 = arith.constant 0.707106769 : f32
    %12 = vector.broadcast %cst_7 : f32 to vector<16x128xf32>
    %13 = arith.mulf %9, %12 : vector<16x128xf32>
    %14 = math.erf %13 : vector<16x128xf32>
    %cst_8 = arith.constant 1.000000e+00 : f32
    %15 = vector.broadcast %cst_8 : f32 to vector<16x128xf32>
    %16 = arith.addf %15, %14 : vector<16x128xf32>
    %17 = arith.mulf %11, %16 : vector<16x128xf32>
    %c0_9 = arith.constant 0 : index
    %c0_10 = arith.constant 0 : index
    %18 = vector.load %arg7[%c0_9, %c0_10] : memref<16x128xf32, #tpu.memory_space<vmem>>, vector<16x128xf32>
    %19 = arith.truncf %17 : vector<16x128xf32> to vector<16x128xbf16>
    %c0_11 = arith.constant 0 : index
    %c0_12 = arith.constant 0 : index
    %20 = vector.load %arg5[%c0_11, %c0_12] : memref<128x128xbf16, #tpu.memory_space<vmem>>, vector<128x128xbf16>
    %cst_13 = arith.constant dense<0.000000e+00> : vector<16x128xf32>
    %21 = tpu.matmul %19, %20, %cst_13 {dimension_numbers = #tpu.dot_dimension_numbers<[1], [0], [0], [1], [0, 0, 1, 1], [], []>} : vector<16x128xbf16>, vector<128x128xbf16>, vector<16x128xf32> -> vector<16x128xf32>
    %22 = arith.addf %18, %21 : vector<16x128xf32>
    %c0_14 = arith.constant 0 : index
    %c0_15 = arith.constant 0 : index
    %23 = vector.load %arg7[%c0_14, %c0_15] : memref<16x128xf32, #tpu.memory_space<vmem>>, vector<16x128xf32>
    tpu.vector_store %arg7[%c0_14, %c0_15], %22 {strides = array<i32>} : memref<16x128xf32, #tpu.memory_space<vmem>>, vector<16x128xf32>,
    return
  }
  func.func @transform_0(%arg0: i32, %arg1: i32) -> (i32, i32) {
    %c0_i32 = arith.constant 0 : i32
    %c0_i32_0 = arith.constant 0 : i32
    return %arg0, %c0_i32 : i32, i32
  }
  func.func @transform_1(%arg0: i32, %arg1: i32) -> (i32, i32) {
    %c0_i32 = arith.constant 0 : i32
    %c0_i32_0 = arith.constant 0 : i32
    return %c0_i32, %arg1 : i32, i32
  }
  func.func @transform_2(%arg0: i32, %arg1: i32) -> (i32, i32) {
    %c0_i32 = arith.constant 0 : i32
    %c0_i32_0 = arith.constant 0 : i32
    return %c0_i32, %arg1 : i32, i32
  }
  func.func @transform_3(%arg0: i32, %arg1: i32) -> (i32, i32) {
    %c0_i32 = arith.constant 0 : i32
    %c0_i32_0 = arith.constant 0 : i32
    return %arg1, %c0_i32 : i32, i32
  }
  func.func @transform_4(%arg0: i32, %arg1: i32) -> (i32, i32) {
    %c0_i32 = arith.constant 0 : i32
    %c0_i32_0 = arith.constant 0 : i32
    %c0_i32_1 = arith.constant 0 : i32
    return %c0_i32, %c0_i32_0 : i32, i32
  }
  func.func @transform_5(%arg0: i32, %arg1: i32) -> (i32, i32) {
    %c0_i32 = arith.constant 0 : i32
    %c0_i32_0 = arith.constant 0 : i32
    return %arg0, %c0_i32 : i32, i32
  }
}

</mosaic_0001>

<bundles_post_ra>
// kernel: feed_forward.1
= control target key start
LH: loop header
LB: loop body
LE: loop exit
PB: predicated region body
PF: predicated region fallthrough
CT: control target
= control target key end

     0   :  { %10 = vsyncpa [#allocation3], 0  ;;  %s533_s0 = inlined_call_operand.vmem [shape: f32[16,128], index: 0, kind: input, shape index: {}]   ;;  %s534_s1 = inlined_call_operand.hbm [shape: bf16[128,128], index: 1, kind: input, shape index: {}]   ;;  %s535_s2 = inlined_call_operand.vmem [shape: f32[1,128], index: 2, kind: input, shape index: {}]   ;;  %s536_s3 = inlined_call_operand.hbm [shape: bf16[128,128], index: 3, kind: input, shape index: {}]   ;;  %s537_s4 = inlined_call_operand.vmem [shape: f32[1,128], index: 4, kind: input, shape index: {}]   ;;  %s538_s5 = inlined_call_operand.vmem [shape: f32[16,128], index: 5, kind: output, shape index: {}]  }
   0x1   :  { %11 = vsyncpa [#allocation5], 0  ;;  %s455_s18 = smov [#allocation2]   ;;  %s407_s22 = scalar_lea.hbm %s534_s1, 1024 }
   0x2   :  { %s19_s19 = sshll.u32 %s455_s18, 4  ;;  %p408_p0 = scmp.ne.s32.totalorder %s534_s1, %s407_s22  ;;  %s20_s19 = int_to_ptr.vmem [resolvable:$true] %s19_s19 }
   0x3   :  { %p411_p1 = scmp.lt.u32.totalorder %s407_s22, %s534_s1 }
   0x5   :  { %p413_p2 = pnand %p411_p1, %p408_p0 }
   0x7   :  { %416 = shalt.err (!%p413_p2)
}
   0x8   :  { %s417_s27 = scalar_lea.vmem %s20_s19, 1024  ;;  %p422_p4 = scmp.lt.s32.totalorder %s20_s19, %s20_s19 }
   0x9   :  { %p418_p3 = scmp.ne.s32.totalorder %s20_s19, %s417_s27  ;;  %p423_p5 = scmp.lt.s32.totalorder %s417_s27, %s417_s27 }
   0xb   :  { %p424_p6 = por %p423_p5, %p422_p4 }
   0xd   :  { %p425_p7 = pnand %p424_p6, %p418_p3 }
   0xf   :  { %428 = shalt.err (!%p425_p7)
}
  0x10   :  { %s456_s28 = smov 64   ;;  %s457_s29 = smov 4  }
  0x11   :  { %25 = dma.hbm_to_vmem [thread:$0]  %s534_s1, 1024, %s20_s19, [#allocation3], %s456_s28, %s456_s28, %s457_s29  }
  0x12   :  { %s458_s7 = smov [#allocation4]   ;;  %s429_s11 = scalar_lea.hbm %s536_s3, 1024 }
  0x13   :  { %s33_s8 = sshll.u32 %s458_s7, 4  ;;  %p430_p8 = scmp.ne.s32.totalorder %s536_s3, %s429_s11  ;;  %s34_s8 = int_to_ptr.vmem [resolvable:$true] %s33_s8 }
  0x14   :  { %p433_p9 = scmp.lt.u32.totalorder %s429_s11, %s536_s3 }
  0x16   :  { %p435_p10 = pnand %p433_p9, %p430_p8 }
  0x18   :  { %438 = shalt.err (!%p435_p10)
}
  0x19   :  { %s439_s16 = scalar_lea.vmem %s34_s8, 1024  ;;  %p444_p12 = scmp.lt.s32.totalorder %s34_s8, %s34_s8 }
  0x1a   :  { %p440_p11 = scmp.ne.s32.totalorder %s34_s8, %s439_s16  ;;  %p445_p13 = scmp.lt.s32.totalorder %s439_s16, %s439_s16 }
  0x1c   :  { %p446_p0 = por %p445_p13, %p444_p12 }
  0x1e   :  { %p447_p1 = pnand %p446_p0, %p440_p11 }
  0x20   :  { %450 = shalt.err (!%p447_p1)
}
  0x21   :  { %39 = dma.hbm_to_vmem [thread:$0]  %s536_s3, 1024, %s34_s8, [#allocation5], %s456_s28, %s456_s28, %s457_s29  }
  0x22   :  { %451 = dma.done.wait [#allocation3], 1024  }
  0x23   :  { %452 = vsyncadd [#allocation3], 4294966272 }
  0x24   :  { %453 = dma.done.wait [#allocation5], 1024  }
  0x25   :  { %454 = vsyncadd [#allocation5], 4294966272  ;;  %v459_v0 = vmov 0.0   ;;  %vm460_vm0 = vmmov 0   ;;  %v387_v1 = vld [vmem:[#allocation2] sm:$0xff]   ;;  %v388_v2 = vld [vmem:[#allocation2 + $0x8] sm:$0xff]  }
  0x26   :  { %341 = vmatprep.subr.bf16.mxu0 %v459_v0  ;;  %357 = vmatprep.mubr.msk.bf16.mxu0 %vm460_vm0, %v459_v0  ;;  %v389_v3 = vld [vmem:[#allocation2 + $0x10] sm:$0xff]   ;;  %v395_v4 = vld [vmem:[#allocation4] sm:$0xff]   ;;  %v390_v5 = vld [vmem:[#allocation2 + $0x18] sm:$0xff]  }
  0x27   :  { %361 = vmatprep.subr.bf16.mxu1 %v459_v0  ;;  %377 = vmatprep.mubr.msk.bf16.mxu1 %vm460_vm0, %v459_v0  ;;  %v396_v6 = vld [vmem:[#allocation4 + $0x8] sm:$0xff]   ;;  %v391_v7 = vld [vmem:[#allocation2 + $0x20] sm:$0xff]   ;;  %v393_v9 = vld [vmem:[#allocation2 + $0x30] sm:$0xff]  }
  0x28   :  { %342 = vmatpush3.bf16.msra.mxu0 %v387_v1  ;;  %362 = vmatpush3.bf16.msra.mxu1 %v395_v4  ;;  %v392_v8 = vld [vmem:[#allocation2 + $0x28] sm:$0xff]   ;;  %v394_v10 = vld [vmem:[#allocation2 + $0x38] sm:$0xff]   ;;  %v62_v11 = vld [vmem:[%s533_s0] sm:$0xff] }
  0x29   :  { %343 = vmatprep.subr.bf16.mxu0 %v459_v0  ;;  %363 = vmatprep.subr.bf16.mxu1 %v459_v0  ;;  %v63_v12 = vld [vmem:[%s533_s0 + $0x8] sm:$0xff]  ;;  %v397_v14 = vld [vmem:[#allocation4 + $0x10] sm:$0xff]   ;;  %v398_v15 = vld [vmem:[#allocation4 + $0x18] sm:$0xff]  }
  0x2a   :  { %v64_v13 = vpack.c.bf16 %v63_v12, %v62_v11  ;;  %v399_v16 = vld [vmem:[#allocation4 + $0x20] sm:$0xff]   ;;  %v400_v17 = vld [vmem:[#allocation4 + $0x28] sm:$0xff]   ;;  %v401_v18 = vld [vmem:[#allocation4 + $0x30] sm:$0xff]  }
  0x2b   :  { %v402_v19 = vld [vmem:[#allocation4 + $0x38] sm:$0xff]   ;;  %v306_v20 = vld [vmem:[%s535_s2] ss:$0 sm:$0xff] }
  0x2c   :  { %344 = vmatpush3.bf16.msra.mxu0 %v388_v2  ;;  %364 = vmatpush3.bf16.msra.mxu1 %v396_v6  ;;  %v305_v38 = vld [vmem:[%s537_s4] ss:$0 sm:$0xff] }
  0x2d   :  { %345 = vmatprep.subr.bf16.mxu0 %v459_v0  ;;  %365 = vmatprep.subr.bf16.mxu1 %v459_v0 }
  0x30   :  { %346 = vmatpush3.bf16.msra.mxu0 %v389_v3  ;;  %366 = vmatpush3.bf16.msra.mxu1 %v397_v14 }
  0x31   :  { %347 = vmatprep.subr.bf16.mxu0 %v459_v0  ;;  %367 = vmatprep.subr.bf16.mxu1 %v459_v0 }
  0x34   :  { %348 = vmatpush3.bf16.msra.mxu0 %v390_v5  ;;  %368 = vmatpush3.bf16.msra.mxu1 %v398_v15 }
  0x35   :  { %349 = vmatprep.subr.bf16.mxu0 %v459_v0  ;;  %369 = vmatprep.subr.bf16.mxu1 %v459_v0 }
  0x38   :  { %350 = vmatpush3.bf16.msra.mxu0 %v391_v7  ;;  %370 = vmatpush3.bf16.msra.mxu1 %v399_v16 }
  0x39   :  { %351 = vmatprep.subr.bf16.mxu0 %v459_v0  ;;  %371 = vmatprep.subr.bf16.mxu1 %v459_v0 }
  0x3c   :  { %352 = vmatpush3.bf16.msra.mxu0 %v392_v8  ;;  %372 = vmatpush3.bf16.msra.mxu1 %v400_v17 }
  0x3d   :  { %353 = vmatprep.subr.bf16.mxu0 %v459_v0  ;;  %373 = vmatprep.subr.bf16.mxu1 %v459_v0 }
  0x40   :  { %354 = vmatpush3.bf16.msra.mxu0 %v393_v9  ;;  %374 = vmatpush3.bf16.msra.mxu1 %v401_v18 }
  0x41   :  { %355 = vmatprep.subr.bf16.mxu0 %v459_v0  ;;  %375 = vmatprep.subr.bf16.mxu1 %v459_v0 }
  0x44   :  { %356 = vmatpush3.bf16.msra.mxu0 %v394_v10  ;;  %376 = vmatpush3.bf16.msra.mxu1 %v402_v19 }
  0x47   :  { %358 = vmatmul.mubr.bf16.vlgmr.msra.gmra.mrb[0].mxu0 %v64_v13 }
 0x11a   :  { %v170_v21 = vpop.f32.mrb[0].mxu0 }
 0x11b   :  { %v171_v22 = vadd.f32 %v306_v20, %v170_v21  ;;  %v359_v23 = vpop.f32.mrb[1].mxu0 }
 0x11c   :  { %v173_v24 = vpop.f32.mrb[2].mxu0 }
 0x11d   :  { %v179_v25 = vmul.f32 0.70710677, %v171_v22  ;;  %v174_v26 = vadd.f32 %v306_v20, %v173_v24  ;;  %v360_v27 = vpop.f32.mrb[3].mxu0  ;;  %v177_v32 = vmul.f32 0.5, %v171_v22 }
 0x11f   :  { %403 = verf.f32 %v179_v25  ;;  %v180_v28 = vmul.f32 0.70710677, %v174_v26  ;;  %v178_v33 = vmul.f32 0.5, %v174_v26 }
 0x121   :  { %405 = verf.f32 %v180_v28 }
 0x129   :  { %v404_v29 = vpop.eup %403 }
 0x12a   :  { %v183_v30 = vadd.f32 1.0, %v404_v29 }
 0x12b   :  { %v406_v31 = vpop.eup %405 }
 0x12c   :  { %v184_v34 = vadd.f32 1.0, %v406_v31  ;;  %v185_v35 = vmul.f32 %v183_v30, %v177_v32 }
 0x12e   :  { %v186_v36 = vmul.f32 %v184_v34, %v178_v33 }
 0x130   :  { %v189_v37 = vpack.c.bf16 %v186_v36, %v185_v35 }
 0x132   :  { %378 = vmatmul.mubr.bf16.vlgmr.msra.gmra.mrb[0].mxu1 %v189_v37 }
 0x205   :  { %v288_v39 = vpop.f32.mrb[0].mxu1 }
 0x206   :  { %v295_v40 = vadd.f32 %v305_v38, %v288_v39  ;;  %v379_v41 = vpop.f32.mrb[1].mxu1 }
 0x207   :  { %v291_v42 = vpop.f32.mrb[2].mxu1 }
 0x208   :  { %297 = vst [vmem:[%s538_s5] sm:$0xff] %v295_v40  ;;  %v296_v43 = vadd.f32 %v305_v38, %v291_v42  ;;  %v380_v44 = vpop.f32.mrb[3].mxu1 }
 0x20a   :  { %298 = vst [vmem:[%s538_s5 + $0x8] sm:$0xff] %v296_v43 }
 0x20b   :  { %303 = vsyncpa [#allocation3], 1 }
 0x20c   :  { %304 = vsyncpa [#allocation5], 1 }

</bundles_post_ra>
